<compile_context>
chip_gen: v6e
topology: v6e:2x2x1
jax: 0.10.0
libtpu: 0.0.40
codegen_flags: <defaults>
</compile_context>

<pallas_src>
import functools

import jax
import jax.numpy as jnp
from jax.experimental import pallas as pl
from jax.experimental.pallas import tpu as pltpu

NUM_HIDDEN_UNITS = 32
IN_FEATURES = 4
OUT_FEATURES = 1


def _round_up(n, m):
    return ((n + m - 1) // m) * m


def mlp_kernel(x_ref, w1_ref, b1_ref, w2_ref, b2_ref, w3_ref, b3_ref, o_ref):
    x = x_ref[...]                                   # [4, TB]   (batch on lanes)
    w1 = w1_ref[...]                                 # [32, 4]

    # Layer 1: K=4 contraction unrolled as VPU broadcast-multiply-adds.
    h1 = w1[:, 0:1] * x[0:1, :]                      # [32, TB]
    for k in range(1, IN_FEATURES):
        h1 = h1 + w1[:, k:k + 1] * x[k:k + 1, :]
    h1 = jnp.maximum(h1 + b1_ref[...], 0.0)          # [32, TB]

    # Layer 2: 32x32 contraction on the MXU with f32 accumulation.
    h2 = jnp.dot(w2_ref[...], h1, preferred_element_type=jnp.float32)
    h2 = jnp.maximum(h2 + b2_ref[...], 0.0)          # [32, TB]

    # Layer 3: single output unit -> VPU multiply + cross-sublane (XLU) reduce.
    out = jnp.sum(h2 * w3_ref[...], axis=0, keepdims=True) + b3_ref[...]
    o_ref[...] = out.astype(o_ref.dtype)             # [1, TB]  lane-dense store


@functools.partial(jax.jit, static_argnames=("block_batch",))
def deep_corrector_mlp(x, params, *, block_batch=4096):
    """Fused forward pass. x: [batch, 4] f32 -> [batch, 1] f32 (PyTorch semantics)."""
    w1, b1, w2, b2, w3, b3 = params
    batch = x.shape[0]

    # Lane-dense batch tile: a multiple of 128 lanes, capped by block_batch.
    tb = _round_up(min(block_batch, _round_up(batch, 128)), 128)
    b_pad = _round_up(batch, tb)

    # Feature-major layout; padded columns are sliced off after the kernel.
    x_fm = jnp.pad(x.T.astype(jnp.float32), ((0, 0), (0, b_pad - batch)))

    def resident(shape):  # whole-array block, constant index -> stays in VMEM
        return pl.BlockSpec(shape, lambda i: (0, 0))

    out_fm = pl.pallas_call(
        mlp_kernel,
        out_shape=jax.ShapeDtypeStruct((OUT_FEATURES, b_pad), jnp.float32),
        grid=(b_pad // tb,),
        in_specs=[
            pl.BlockSpec((IN_FEATURES, tb), lambda i: (0, i)),      # x tile
            resident((NUM_HIDDEN_UNITS, IN_FEATURES)),              # w1 [32,4]
            resident((NUM_HIDDEN_UNITS, 1)),                        # b1 [32,1]
            resident((NUM_HIDDEN_UNITS, NUM_HIDDEN_UNITS)),         # w2 [32,32]
            resident((NUM_HIDDEN_UNITS, 1)),                        # b2 [32,1]
            resident((NUM_HIDDEN_UNITS, 1)),                        # w3 [32,1]
            resident((1, 1)),                                       # b3 [1,1]
        ],
        out_specs=pl.BlockSpec((OUT_FEATURES, tb), lambda i: (0, i)),
        compiler_params=pltpu.CompilerParams(
            dimension_semantics=("parallel",)),
    )(x_fm, w1, b1, w2, b2, w3, b3)

    return out_fm[:, :batch].T                       # [batch, 1]


def init_params(key):
    """PyTorch nn.Linear default init (uniform +-1/sqrt(fan_in)), stored feature-major:
    weights [out, in], biases [out, 1]; w3 kept as a [32, 1] column for the kernel."""
    def linear_init(k, fan_in, fan_out):
        kw, kb = jax.random.split(k)
        bound = 1.0 / (float(fan_in) ** 0.5)
        w = jax.random.uniform(kw, (fan_out, fan_in), jnp.float32, -bound, bound)
        b = jax.random.uniform(kb, (fan_out, 1), jnp.float32, -bound, bound)
        return w, b

    k1, k2, k3 = jax.random.split(key, 3)
    w1, b1 = linear_init(k1, IN_FEATURES, NUM_HIDDEN_UNITS)
    w2, b2 = linear_init(k2, NUM_HIDDEN_UNITS, NUM_HIDDEN_UNITS)
    w3_row, b3 = linear_init(k3, NUM_HIDDEN_UNITS, OUT_FEATURES)   # [1, 32]
    return (w1, b1, w2, b2, w3_row.T, b3)                          # w3 -> [32, 1]


def reference_forward(x, params):
    """Plain-JAX reference of the same forward pass."""
    w1, b1, w2, b2, w3, b3 = params
    h1 = jnp.maximum(x @ w1.T + b1.T, 0.0)
    h2 = jnp.maximum(h1 @ w2.T + b2.T, 0.0)
    return h2 @ w3 + b3.T


if __name__ == "__main__":
    key = jax.random.PRNGKey(0)
    kx, kp = jax.random.split(key)
    params = init_params(kp)

    # Small shape consistent with the module: batch=8, in_features=4.
    x_small = jax.random.normal(kx, (8, IN_FEATURES), jnp.float32)
    out_small = jax.block_until_ready(deep_corrector_mlp(x_small, params))
    assert out_small.shape == (8, OUT_FEATURES)
    assert jnp.allclose(out_small, reference_forward(x_small, params),
                        atol=1e-5, rtol=1e-5)

    # Exercise the multi-tile + padded path (grid > 1, batch not a tile multiple).
    x_big = jax.random.normal(kx, (300, IN_FEATURES), jnp.float32)
    out_big = jax.block_until_ready(
        deep_corrector_mlp(x_big, params, block_batch=128))
    assert out_big.shape == (300, OUT_FEATURES)
    assert jnp.allclose(out_big, reference_forward(x_big, params),
                        atol=1e-5, rtol=1e-5)

    print("KERNEL_OK")
</pallas_src>

<mosaic_0001>
module attributes {stable_mosaic.version = 11 : i64} {
  func.func @mlp_kernel(%arg0: i32, %arg1: memref<4x128xf32, #tpu.memory_space<vmem>>, %arg2: memref<32x4xf32, #tpu.memory_space<vmem>>, %arg3: memref<32x1xf32, #tpu.memory_space<vmem>>, %arg4: memref<32x32xf32, #tpu.memory_space<vmem>>, %arg5: memref<32x1xf32, #tpu.memory_space<vmem>>, %arg6: memref<32x1xf32, #tpu.memory_space<vmem>>, %arg7: memref<1x1xf32, #tpu.memory_space<vmem>>, %arg8: memref<1x128xf32, #tpu.memory_space<vmem>>) attributes {dimension_semantics = [#tpu.dimension_semantics<parallel>], iteration_bounds = array<i64: 1>, scalar_prefetch = 0 : i64, scratch_operands = 0 : i64, tpu.core_type = #tpu.core_type<tc>, window_params = [{transform_indices = @transform_0, window_bounds = array<i64: 4, 128>}, {pipeline_mode = #tpu.pipeline_mode<synchronous>, transform_indices = @transform_1, window_bounds = array<i64: 32, 4>}, {pipeline_mode = #tpu.pipeline_mode<synchronous>, transform_indices = @transform_2, window_bounds = array<i64: 32, 1>}, {pipeline_mode = #tpu.pipeline_mode<synchronous>, transform_indices = @transform_3, window_bounds = array<i64: 32, 32>}, {pipeline_mode = #tpu.pipeline_mode<synchronous>, transform_indices = @transform_4, window_bounds = array<i64: 32, 1>}, {pipeline_mode = #tpu.pipeline_mode<synchronous>, transform_indices = @transform_5, window_bounds = array<i64: 32, 1>}, {pipeline_mode = #tpu.pipeline_mode<synchronous>, transform_indices = @transform_6, window_bounds = array<i64: 1, 1>}, {transform_indices = @transform_7, window_bounds = array<i64: 1, 128>}]} {
    %c0 = arith.constant 0 : index
    %c0_0 = arith.constant 0 : index
    %0 = vector.load %arg1[%c0, %c0_0] : memref<4x128xf32, #tpu.memory_space<vmem>>, vector<4x128xf32>
    %c0_1 = arith.constant 0 : index
    %c0_2 = arith.constant 0 : index
    %1 = vector.load %arg2[%c0_1, %c0_2] : memref<32x4xf32, #tpu.memory_space<vmem>>, vector<32x4xf32>
    %2 = vector.extract_strided_slice %1 {offsets = [0, 0], sizes = [32, 1], strides = [1, 1]} : vector<32x4xf32> to vector<32x1xf32>
    %3 = vector.extract_strided_slice %0 {offsets = [0, 0], sizes = [1, 128], strides = [1, 1]} : vector<4x128xf32> to vector<1x128xf32>
    %4 = vector.broadcast %2 : vector<32x1xf32> to vector<32x128xf32>
    %5 = vector.broadcast %3 : vector<1x128xf32> to vector<32x128xf32>
    %6 = arith.mulf %4, %5 : vector<32x128xf32>
    %7 = vector.extract_strided_slice %1 {offsets = [0, 1], sizes = [32, 1], strides = [1, 1]} : vector<32x4xf32> to vector<32x1xf32>
    %8 = vector.extract_strided_slice %0 {offsets = [1, 0], sizes = [1, 128], strides = [1, 1]} : vector<4x128xf32> to vector<1x128xf32>
    %9 = vector.broadcast %7 : vector<32x1xf32> to vector<32x128xf32>
    %10 = vector.broadcast %8 : vector<1x128xf32> to vector<32x128xf32>
    %11 = arith.mulf %9, %10 : vector<32x128xf32>
    %12 = arith.addf %6, %11 : vector<32x128xf32>
    %13 = vector.extract_strided_slice %1 {offsets = [0, 2], sizes = [32, 1], strides = [1, 1]} : vector<32x4xf32> to vector<32x1xf32>
    %14 = vector.extract_strided_slice %0 {offsets = [2, 0], sizes = [1, 128], strides = [1, 1]} : vector<4x128xf32> to vector<1x128xf32>
    %15 = vector.broadcast %13 : vector<32x1xf32> to vector<32x128xf32>
    %16 = vector.broadcast %14 : vector<1x128xf32> to vector<32x128xf32>
    %17 = arith.mulf %15, %16 : vector<32x128xf32>
    %18 = arith.addf %12, %17 : vector<32x128xf32>
    %19 = vector.extract_strided_slice %1 {offsets = [0, 3], sizes = [32, 1], strides = [1, 1]} : vector<32x4xf32> to vector<32x1xf32>
    %20 = vector.extract_strided_slice %0 {offsets = [3, 0], sizes = [1, 128], strides = [1, 1]} : vector<4x128xf32> to vector<1x128xf32>
    %21 = vector.broadcast %19 : vector<32x1xf32> to vector<32x128xf32>
    %22 = vector.broadcast %20 : vector<1x128xf32> to vector<32x128xf32>
    %23 = arith.mulf %21, %22 : vector<32x128xf32>
    %24 = arith.addf %18, %23 : vector<32x128xf32>
    %c0_3 = arith.constant 0 : index
    %c0_4 = arith.constant 0 : index
    %25 = vector.load %arg3[%c0_3, %c0_4] : memref<32x1xf32, #tpu.memory_space<vmem>>, vector<32x1xf32>
    %26 = vector.broadcast %25 : vector<32x1xf32> to vector<32x128xf32>
    %27 = arith.addf %24, %26 : vector<32x128xf32>
    %cst = arith.constant 0.000000e+00 : f32
    %28 = vector.broadcast %cst : f32 to vector<32x128xf32>
    %29 = arith.maximumf %27, %28 : vector<32x128xf32>
    %c0_5 = arith.constant 0 : index
    %c0_6 = arith.constant 0 : index
    %30 = vector.load %arg4[%c0_5, %c0_6] : memref<32x32xf32, #tpu.memory_space<vmem>>, vector<32x32xf32>
    %cst_7 = arith.constant dense<0.000000e+00> : vector<32x128xf32>
    %31 = tpu.matmul %30, %29, %cst_7 {dimension_numbers = #tpu.dot_dimension_numbers<[1], [0], [0], [1], [0, 0, 1, 1], [], []>} : vector<32x32xf32>, vector<32x128xf32>, vector<32x128xf32> -> vector<32x128xf32>
    %c0_8 = arith.constant 0 : index
    %c0_9 = arith.constant 0 : index
    %32 = vector.load %arg5[%c0_8, %c0_9] : memref<32x1xf32, #tpu.memory_space<vmem>>, vector<32x1xf32>
    %33 = vector.broadcast %32 : vector<32x1xf32> to vector<32x128xf32>
    %34 = arith.addf %31, %33 : vector<32x128xf32>
    %cst_10 = arith.constant 0.000000e+00 : f32
    %35 = vector.broadcast %cst_10 : f32 to vector<32x128xf32>
    %36 = arith.maximumf %34, %35 : vector<32x128xf32>
    %c0_11 = arith.constant 0 : index
    %c0_12 = arith.constant 0 : index
    %37 = vector.load %arg6[%c0_11, %c0_12] : memref<32x1xf32, #tpu.memory_space<vmem>>, vector<32x1xf32>
    %38 = vector.broadcast %37 : vector<32x1xf32> to vector<32x128xf32>
    %39 = arith.mulf %36, %38 : vector<32x128xf32>
    %cst_13 = arith.constant dense<0.000000e+00> : vector<128xf32>
    %40 = vector.multi_reduction <add>, %39, %cst_13 [0] : vector<32x128xf32> to vector<128xf32>
    %41 = vector.shape_cast %40 : vector<128xf32> to vector<1x128xf32>
    %c0_14 = arith.constant 0 : index
    %c0_15 = arith.constant 0 : index
    %42 = vector.load %arg7[%c0_14, %c0_15] : memref<1x1xf32, #tpu.memory_space<vmem>>, vector<1x1xf32>
    %43 = vector.broadcast %42 : vector<1x1xf32> to vector<1x128xf32>
    %44 = arith.addf %41, %43 : vector<1x128xf32>
    %c0_16 = arith.constant 0 : index
    %c0_17 = arith.constant 0 : index
    %45 = vector.load %arg8[%c0_16, %c0_17] : memref<1x128xf32, #tpu.memory_space<vmem>>, vector<1x128xf32>
    tpu.vector_store %arg8[%c0_16, %c0_17], %44 {strides = array<i32>} : memref<1x128xf32, #tpu.memory_space<vmem>>, vector<1x128xf32>,
    return
  }
  func.func @transform_0(%arg0: i32) -> (i32, i32) {
    %c0_i32 = arith.constant 0 : i32
    %c0_i32_0 = arith.constant 0 : i32
    return %c0_i32, %arg0 : i32, i32
  }
  func.func @transform_1(%arg0: i32) -> (i32, i32) {
    %c0_i32 = arith.constant 0 : i32
    %c0_i32_0 = arith.constant 0 : i32
    %c0_i32_1 = arith.constant 0 : i32
    return %c0_i32, %c0_i32_0 : i32, i32
  }
  func.func @transform_2(%arg0: i32) -> (i32, i32) {
    %c0_i32 = arith.constant 0 : i32
    %c0_i32_0 = arith.constant 0 : i32
    %c0_i32_1 = arith.constant 0 : i32
    return %c0_i32, %c0_i32_0 : i32, i32
  }
  func.func @transform_3(%arg0: i32) -> (i32, i32) {
    %c0_i32 = arith.constant 0 : i32
    %c0_i32_0 = arith.constant 0 : i32
    %c0_i32_1 = arith.constant 0 : i32
    return %c0_i32, %c0_i32_0 : i32, i32
  }
  func.func @transform_4(%arg0: i32) -> (i32, i32) {
    %c0_i32 = arith.constant 0 : i32
    %c0_i32_0 = arith.constant 0 : i32
    %c0_i32_1 = arith.constant 0 : i32
    return %c0_i32, %c0_i32_0 : i32, i32
  }
  func.func @transform_5(%arg0: i32) -> (i32, i32) {
    %c0_i32 = arith.constant 0 : i32
    %c0_i32_0 = arith.constant 0 : i32
    %c0_i32_1 = arith.constant 0 : i32
    return %c0_i32, %c0_i32_0 : i32, i32
  }
  func.func @transform_6(%arg0: i32) -> (i32, i32) {
    %c0_i32 = arith.constant 0 : i32
    %c0_i32_0 = arith.constant 0 : i32
    %c0_i32_1 = arith.constant 0 : i32
    return %c0_i32, %c0_i32_0 : i32, i32
  }
  func.func @transform_7(%arg0: i32) -> (i32, i32) {
    %c0_i32 = arith.constant 0 : i32
    %c0_i32_0 = arith.constant 0 : i32
    return %c0_i32, %arg0 : i32, i32
  }
}

</mosaic_0001>

<bundles_post_ra>
// kernel: deep_corrector_mlp.1
= control target key start
LH: loop header
LB: loop body
LE: loop exit
PB: predicated region body
PF: predicated region fallthrough
CT: control target
= control target key end

     0   :  { %v415_v0 = vmov 1   ;;  %v416_v1 = vmov 0   ;;  %v417_v6 = vmov 2   ;;  %v418_v7 = vmov 3   ;;  %s542_s1 = inlined_call_operand.vmem [shape: f32[32,4], index: 1, kind: input, shape index: {}]   ;;  %s543_s6 = inlined_call_operand.<no memory space> [shape: f32[1,1], index: 6, kind: input, shape index: {}]   ;;  %s544_s2 = inlined_call_operand.vmem [shape: f32[32,1], index: 2, kind: input, shape index: {}]   ;;  %s545_s4 = inlined_call_operand.vmem [shape: f32[32,1], index: 4, kind: input, shape index: {}]   ;;  %s546_s5 = inlined_call_operand.vmem [shape: f32[32,1], index: 5, kind: input, shape index: {}]   ;;  %s547_s3 = inlined_call_operand.vmem [shape: f32[32,32], index: 3, kind: input, shape index: {}]   ;;  %s548_s0 = inlined_call_operand.vmem [shape: f32[4,128], index: 0, kind: input, shape index: {}]   ;;  %s549_s7 = inlined_call_operand.vmem [shape: f32[1,128], index: 7, kind: output, shape index: {}]  }
   0x1   :  { %398 = vset.pattern.permute.xlu0 %v415_v0  ;;  %400 = vset.pattern.permute.xlu1 %v416_v1  ;;  %v32_v2 = vld [vmem:[%s542_s1 + $0x18] sm:$0xff]  ;;  %v31_v3 = vld [vmem:[%s542_s1 + $0x10] sm:$0xff]  ;;  %v12_v4 = vstv %s543_s6  ;;  %v30_v5 = vld [vmem:[%s542_s1 + $0x8] sm:$0xff]  ;;  %vm205_vm0 = vcmask 261120   ;;  %v53_v30 = vlaneseq }
   0x2   :  { %74 = vperm.xlu0 %398, %v32_v2   ;;  %45 = vperm.xlu1 %400, %v31_v3   ;;  %13 = vst [vmem:[#allocation2] sm:$0x1] %v12_v4  ;;  %v29_v8 = vld [vmem:[%s542_s1] sm:$0xff]  ;;  %v147_v9 = vld [vmem:[%s544_s2 + $0x10] sm:$0xff]  ;;  %v148_v14 = vld [vmem:[%s544_s2 + $0x18] sm:$0xff] }
   0x3   :  { %v181_v10 = vld [vmem:[%s545_s4] sm:$0xff]  ;;  %v183_v11 = vld [vmem:[%s545_s4 + $0x10] sm:$0xff]  ;;  %v146_v16 = vld [vmem:[%s544_s2 + $0x8] sm:$0xff]  ;;  %v518_v33 = vshrl.u32 %v53_v30, 7 }
   0x4   :  { %v307_v12 = vld [vmem:[%s546_s5] sm:$0xff]  ;;  %v309_v13 = vld [vmem:[%s546_s5 + $0x10] sm:$0xff]  ;;  %v182_v20 = vld [vmem:[%s545_s4 + $0x8] sm:$0xff] }
   0x5   :  { %v145_v17 = vld [vmem:[%s544_s2] sm:$0xff]  ;;  %v179_v19 = vld [vmem:[%s547_s3 + $0x10] sm:$0xff]  ;;  %v184_v21 = vld [vmem:[%s545_s4 + $0x18] sm:$0xff]  ;;  %v79_v35 = vsub.s32 1, %v518_v33  ;;  %v55_v36 = vsub.s32 0, %v518_v33  ;;  %v107_v40 = vsub.s32 2, %v518_v33 }
   0x6   :  { %399 = vset.pattern.permute.xlu0 %v416_v1  ;;  %401 = vset.pattern.permute.xlu1 %v415_v0  ;;  %v177_v18 = vld [vmem:[%s547_s3] sm:$0xff]  ;;  %v308_v22 = vld [vmem:[%s546_s5 + $0x8] sm:$0xff]  ;;  %v310_v23 = vld [vmem:[%s546_s5 + $0x18] sm:$0xff]  ;;  %v135_v43 = vsub.s32 3, %v518_v33 }
   0x7   :  { %50 = vperm.xlu0 %399, %v32_v2   ;;  %70 = vperm.xlu1 %401, %v31_v3   ;;  %v28_v37 = vld [vmem:[%s548_s0] sm:$0xf] }
   0x8   :  { %380 = vmatprep.mubr.msk.f32.mxu0 %vm205_vm0, %v177_v18  ;;  %383 = vmatprep.mubr.msk.f32.mxu1 %vm205_vm0, %v179_v19  ;;  %v80_v39 = vrot.slane %v28_v37, %v79_v35  ;;  %v56_v42 = vrot.slane %v28_v37, %v55_v36  ;;  %v108_v47 = vrot.slane %v28_v37, %v107_v40 }
   0x9   :  { %v344_v15 = vld [vmem:[#allocation2] sm:$0x1]  ;;  %v136_v51 = vrot.slane %v28_v37, %v135_v43 }
   0xb   :  { %402 = vset.pattern.permute.xlu1 %v417_v6  ;;  %40 = vperm.xlu0 %399, %v30_v5  }
   0xc   :  { %102 = vperm.xlu1 %402, %v32_v2  }
   0xf   :  { %407 = vset.pattern.permute.xlu0 %v417_v6 }
  0x10   :  { %403 = vset.pattern.permute.xlu1 %v415_v0  ;;  %94 = vperm.xlu0 %407, %v30_v5  }
  0x11   :  { %66 = vperm.xlu1 %403, %v30_v5  }
  0x14   :  { %408 = vset.pattern.permute.xlu0 %v418_v7 }
  0x15   :  { %404 = vset.pattern.permute.xlu1 %v417_v6  ;;  %130 = vperm.xlu0 %408, %v32_v2  }
  0x16   :  { %98 = vperm.xlu1 %404, %v31_v3  }
  0x19   :  { %122 = vperm.xlu0 %408, %v30_v5  }
  0x1a   :  { %405 = vset.pattern.permute.xlu1 %v416_v1 }
  0x1b   :  { %35 = vperm.xlu1 %405, %v29_v8  }
  0x1d   :  { %413 = vset.pattern.permute.xlu0 %v416_v1 }
  0x1e   :  { %161 = vperm.xlu0 %413, %v147_v9  }
  0x1f   :  { %406 = vset.pattern.permute.xlu1 %v415_v0 }
  0x20   :  { %62 = vperm.xlu1 %406, %v29_v8  }
  0x22   :  { %187 = vperm.xlu0 %413, %v181_v10  }
  0x24   :  { %409 = vset.pattern.permute.xlu1 %v418_v7 }
  0x25   :  { %126 = vperm.xlu1 %409, %v31_v3  }
  0x26   :  { %197 = vperm.xlu0 %413, %v183_v11  }
  0x29   :  { %410 = vset.pattern.permute.xlu1 %v417_v6 }
  0x2a   :  { %90 = vperm.xlu1 %410, %v29_v8   ;;  %313 = vperm.xlu0 %413, %v307_v12  }
  0x2e   :  { %411 = vset.pattern.permute.xlu1 %v416_v1  ;;  %323 = vperm.xlu0 %413, %v309_v13  }
  0x2f   :  { %166 = vperm.xlu1 %411, %v148_v14  }
  0x32   :  { %347 = vperm.xlu0 %413, %v344_v15  }
  0x33   :  { %412 = vset.pattern.permute.xlu1 %v418_v7 }
  0x34   :  { %118 = vperm.xlu1 %412, %v29_v8  }
  0x38   :  { %414 = vset.pattern.permute.xlu1 %v416_v1 }
  0x39   :  { %156 = vperm.xlu1 %414, %v146_v16  }
  0x3d   :  { %151 = vperm.xlu1 %414, %v145_v17  }
  0x41   :  { %192 = vperm.xlu1 %414, %v182_v20  }
  0x45   :  { %202 = vperm.xlu1 %414, %v184_v21  }
  0x49   :  { %318 = vperm.xlu1 %414, %v308_v22  }
  0x4d   :  { %328 = vperm.xlu1 %414, %v310_v23  }
  0x7d   :  { %v46_v24 = vpop.permute.xlu1 %45  ;;  %v75_v27 = vpop.permute.xlu0 %74 }
  0x7e   :  { %v84_v44 = vmul.f32 %v80_v39, %v75_v27  ;;  %v59_v50 = vmul.f32 %v56_v42, %v46_v24  ;;  %v178_v27 = vld [vmem:[%s547_s3 + $0x8] sm:$0xff] }
  0x82   :  { %v71_v25 = vpop.permute.xlu1 %70  ;;  %v51_v29 = vpop.permute.xlu0 %50 }
  0x83   :  { %v83_v45 = vmul.f32 %v80_v39, %v71_v25  ;;  %v60_v46 = vmul.f32 %v56_v42, %v51_v29 }
  0x85   :  { %v87_v53 = vadd.f32 %v83_v45, %v59_v50  ;;  %v88_v54 = vadd.f32 %v84_v44, %v60_v46 }
  0x86   :  { %v41_v32 = vpop.permute.xlu0 %40 }
  0x87   :  { %v103_v26 = vpop.permute.xlu1 %102  ;;  %v58_v63 = vmul.f32 %v56_v42, %v41_v32 }
  0x88   :  { %v112_v55 = vmul.f32 %v108_v47, %v103_v26 }
  0x8a   :  { %v116_v61 = vadd.f32 %v112_v55, %v88_v54 }
  0x8b   :  { %v95_v38 = vpop.permute.xlu0 %94 }
  0x8c   :  { %v67_v28 = vpop.permute.xlu1 %66  ;;  %v110_v7 = vmul.f32 %v108_v47, %v95_v38 }
  0x8d   :  { %v82_v0 = vmul.f32 %v80_v39, %v67_v28  ;;  %v180_v28 = vld [vmem:[%s547_s3 + $0x18] sm:$0xff] }
  0x8f   :  { %v86_v6 = vadd.f32 %v82_v0, %v58_v63 }
  0x90   :  { %v131_v48 = vpop.permute.xlu0 %130 }
  0x91   :  { %v99_v31 = vpop.permute.xlu1 %98  ;;  %v140_v57 = vmul.f32 %v136_v51, %v131_v48  ;;  %v114_v13 = vadd.f32 %v110_v7, %v86_v6 }
  0x92   :  { %v111_v52 = vmul.f32 %v108_v47, %v99_v31 }
  0x93   :  { %v144_v1 = vadd.f32 %v140_v57, %v116_v61 }
  0x94   :  { %v115_v58 = vadd.f32 %v111_v52, %v87_v53  ;;  %v123_v60 = vpop.permute.xlu0 %122 }
  0x95   :  { %v138_v9 = vmul.f32 %v136_v51, %v123_v60 }
  0x96   :  { %v36_v34 = vpop.permute.xlu1 %35 }
  0x97   :  { %v57_v14 = vmul.f32 %v56_v42, %v36_v34  ;;  %v142_v18 = vadd.f32 %v138_v9, %v114_v13 }
  0x99   :  { %v162_v2 = vpop.permute.xlu0 %161 }
  0x9b   :  { %v63_v41 = vpop.permute.xlu1 %62 }
  0x9c   :  { %v81_v10 = vmul.f32 %v80_v39, %v63_v41 }
  0x9d   :  { %v188_v29 = vpop.permute.xlu0 %187 }
  0x9e   :  { %v85_v16 = vadd.f32 %v81_v10, %v57_v14 }
  0xa0   :  { %v127_v49 = vpop.permute.xlu1 %126 }
  0xa1   :  { %v139_v56 = vmul.f32 %v136_v51, %v127_v49  ;;  %v198_v31 = vpop.permute.xlu0 %197 }
  0xa3   :  { %v143_v62 = vadd.f32 %v139_v56, %v115_v58 }
  0xa5   :  { %v91_v59 = vpop.permute.xlu1 %90  ;;  %v171_v4 = vadd.f32 %v162_v2, %v143_v62  ;;  %v314_v37 = vpop.permute.xlu0 %313 }
  0xa6   :  { %v109_v15 = vmul.f32 %v108_v47, %v91_v59 }
  0xa7   :  { %v175_v11 = vmax.f32 %v171_v4, 0.0 }
  0xa8   :  { %v113_v20 = vadd.f32 %v109_v15, %v85_v16 }
  0xaa   :  { %v167_v3 = vpop.permute.xlu1 %166 }
  0xab   :  { %v172_v5 = vadd.f32 %v167_v3, %v144_v1 }
  0xad   :  { %v176_v8 = vmax.f32 %v172_v5, 0.0 }
  0xaf   :  { %v119_v12 = vpop.permute.xlu1 %118  ;;  %372 = vmatprep.subr.mxu0 %v176_v8  ;;  %386 = vmatprep.subr.mxu1 %v176_v8 }
  0xb0   :  { %373 = vmatpush3.msra.mxu0 %v176_v8  ;;  %390 = vmatpush3.msra.mxu1 %v176_v8  ;;  %v137_v17 = vmul.f32 %v136_v51, %v119_v12  ;;  %v324_v51 = vpop.permute.xlu0 %323 }
  0xb1   :  { %374 = vmatprep.subr.mxu0 %v175_v11  ;;  %387 = vmatprep.subr.mxu1 %v175_v11 }
  0xb2   :  { %375 = vmatpush3.msra.mxu0 %v175_v11  ;;  %391 = vmatpush3.msra.mxu1 %v175_v11  ;;  %v141_v23 = vadd.f32 %v137_v17, %v113_v20 }
  0xb4   :  { %v157_v19 = vpop.permute.xlu1 %156  ;;  %v348_v62 = vpop.permute.xlu0 %347 }
  0xb5   :  { %v170_v21 = vadd.f32 %v157_v19, %v142_v18  ;;  %v353_v0 = vrot.slane %v348_v62, %v55_v36 }
  0xb7   :  { %v174_v22 = vmax.f32 %v170_v21, 0.0 }
  0xb8   :  { %v152_v24 = vpop.permute.xlu1 %151 }
  0xb9   :  { %v169_v25 = vadd.f32 %v152_v24, %v141_v23  ;;  %376 = vmatprep.subr.mxu0 %v174_v22  ;;  %388 = vmatprep.subr.mxu1 %v174_v22 }
  0xba   :  { %377 = vmatpush3.msra.mxu0 %v174_v22  ;;  %392 = vmatpush3.msra.mxu1 %v174_v22 }
  0xbb   :  { %v173_v26 = vmax.f32 %v169_v25, 0.0 }
  0xbc   :  { %v193_v30 = vpop.permute.xlu1 %192 }
  0xbd   :  { %378 = vmatprep.subr.mxu0 %v173_v26  ;;  %389 = vmatprep.subr.mxu1 %v173_v26 }
  0xbe   :  { %379 = vmatpush3.msra.mxu0 %v173_v26  ;;  %393 = vmatpush3.msra.mxu1 %v173_v26 }
  0xbf   :  { %381 = vmatmul.mubr.msk.f32.vlgmr.msra.gmra.mxu0 %vm205_vm0, %v178_v27  ;;  %384 = vmatmul.mubr.msk.f32.vlgmr.msra.gmra.mxu1 %vm205_vm0, %v180_v28 }
  0xc0   :  { %v203_v32 = vpop.permute.xlu1 %202 }
  0xc4   :  { %v319_v45 = vpop.permute.xlu1 %318 }
  0xc8   :  { %v329_v54 = vpop.permute.xlu1 %328 }
 0x17f   :  { %v382_v34 = vpop.f32.mrf.mxu0  ;;  %v385_v35 = vpop.f32.mrf.mxu1 }
 0x180   :  { %v290_v38 = vadd.f32 %v382_v34, %v193_v30  ;;  %v300_v42 = vadd.f32 %v385_v35, %v203_v32 }
 0x181   :  { %v284_v39 = vpop.f32.mrf.mxu0  ;;  %v294_v40 = vpop.f32.mrf.mxu1 }
 0x182   :  { %v304_v41 = vmax.f32 %v290_v38, 0.0  ;;  %v285_v43 = vadd.f32 %v284_v39, %v188_v29  ;;  %v295_v44 = vadd.f32 %v294_v40, %v198_v31  ;;  %v306_v49 = vmax.f32 %v300_v42, 0.0 }
 0x184   :  { %v303_v46 = vmax.f32 %v285_v43, 0.0  ;;  %v305_v47 = vmax.f32 %v295_v44, 0.0  ;;  %v332_v48 = vmul.f32 %v319_v45, %v304_v41  ;;  %v334_v55 = vmul.f32 %v329_v54, %v306_v49 }
 0x186   :  { %v331_v50 = vmul.f32 %v314_v37, %v303_v46  ;;  %v333_v53 = vmul.f32 %v324_v51, %v305_v47 }
 0x188   :  { %v335_v52 = vadd.f32 %v332_v48, %v331_v50 }
 0x18a   :  { %v336_v56 = vadd.f32 %v335_v52, %v333_v53 }
 0x18c   :  { %v337_v57 = vadd.f32 %v336_v56, %v334_v55 }
 0x18e   :  { %v338_v58 = vrot.slane %v337_v57, 4 }
 0x190   :  { %v339_v59 = vadd.f32 %v338_v58, %v337_v57 }
 0x192   :  { %v340_v60 = vrot.slane %v339_v59, 2 }
 0x194   :  { %v341_v61 = vadd.f32 %v340_v60, %v339_v59 }
 0x196   :  { %v342_v63 = vrot.slane %v341_v61, 1 }
 0x198   :  { %v343_v1 = vadd.f32 %v342_v63, %v341_v61 }
 0x19a   :  { %v354_v2 = vadd.f32 %v353_v0, %v343_v1 }
 0x19c   :  { %355 = vst [vmem:[%s549_s7] sm:$0x1] %v354_v2 }

</bundles_post_ra>
